<compile_context>
chip_gen: v7x
topology: tpu7x:2x2x1
jax: 0.10.0
libtpu: 0.0.40
codegen_flags: <defaults>
</compile_context>

<pallas_src>
import random
import functools

import jax
import jax.numpy as jnp
from jax.experimental import pallas as pl
from jax.experimental.pallas import tpu as pltpu


def _round_up(x, m):
    return (x + m - 1) // m * m


def _plan_rows(N, max_tile_n):
    """Pick (tile_n, padded_N).

    Prefers a tile that divides the (at most 8-row padded) batch so no
    full-array jnp.pad of x is needed, and caps the tile at half the batch for
    N >= 64 so the parallel grid axis has >= 2 steps (uses both v7x cores).
    """
    # Single-tile fast path: a block equal to the full dim needs no 8-row
    # padding, and tiny batches don't benefit from splitting.
    if N <= max_tile_n and N < 64:
        return N, N
    N8 = _round_up(N, 8)
    cap = min(max_tile_n, N8)
    if N8 >= 64:
        cap = min(cap, N8 // 2)      # guarantee >= 2 grid steps
    cap -= cap % 8
    cap = max(cap, 8)
    t = cap
    while N8 % t != 0:               # largest multiple of 8 dividing N8
        t -= 8
    return t, N8


def _make_dynamicnet_kernel(n_mid):
    """Build a kernel specialized on the (static) number of middle layers."""

    def kernel(x_ref,                 # (tile_n, D_in)
               w_in_ref, b_in_ref,    # (D_in, H), (1, H)
               w_mid_ref, b_mid_ref,  # (H, H),    (1, H)
               w_out_ref, b_out_ref,  # (H, D_out), (1, D_out)
               o_ref):                # (tile_n, D_out)
        # Input layer + ReLU. Hidden state `h` stays in vregs.
        h = jnp.dot(x_ref[...], w_in_ref[...],
                    preferred_element_type=jnp.float32)
        h = jnp.maximum(h + b_in_ref[...], 0.0)

        # Middle layers, fully unrolled (weight sharing as in the PyTorch
        # module). Weight/bias loads hoisted; bias stays (1, H) and broadcasts
        # in the add (no (tile_n, H) materialization -> no vreg-spill hazard).
        if n_mid > 0:
            w_mid = w_mid_ref[...]
            b_mid = b_mid_ref[...]
            for _ in range(n_mid):
                m = jnp.dot(h, w_mid, preferred_element_type=jnp.float32)
                h = jnp.maximum(m + b_mid, 0.0)

        # Output layer (no activation).
        y = jnp.dot(h, w_out_ref[...], preferred_element_type=jnp.float32)
        o_ref[...] = y + b_out_ref[...]

    return kernel


@functools.partial(jax.jit, static_argnames=("n_mid", "tile_n"))
def _dynamicnet_call(x_p, w_in, b_in, w_mid, b_mid, w_out, b_out,
                     *, n_mid, tile_n):
    N_p, D_in = x_p.shape
    H = w_in.shape[1]
    D_out = w_out.shape[1]
    grid = (N_p // tile_n,)

    const2 = lambda i: (0, 0)  # weights/biases: resident across grid steps

    return pl.pallas_call(
        _make_dynamicnet_kernel(n_mid),
        out_shape=jax.ShapeDtypeStruct((N_p, D_out), jnp.float32),
        grid=grid,
        in_specs=[
            pl.BlockSpec((tile_n, D_in), lambda i: (i, 0)),   # x row-tile
            pl.BlockSpec((D_in, H), const2),
            pl.BlockSpec((1, H), const2),
            pl.BlockSpec((H, H), const2),
            pl.BlockSpec((1, H), const2),
            pl.BlockSpec((H, D_out), const2),
            pl.BlockSpec((1, D_out), const2),
        ],
        out_specs=pl.BlockSpec((tile_n, D_out), lambda i: (i, 0)),
        compiler_params=pltpu.CompilerParams(
            dimension_semantics=("parallel",)),
    )(x_p, w_in, b_in, w_mid, b_mid, w_out, b_out)


def dynamicnet_forward(x, params, n_mid, *, max_tile_n=512):
    """x: (N, D_in) f32. params: dict of weights. n_mid: python int in [0, 4]."""
    N, _ = x.shape
    D_out = params["w_out"].shape[1]

    tile_n, N_p = _plan_rows(N, max_tile_n)
    x_p = x if N_p == N else jnp.pad(x, ((0, N_p - N), (0, 0)))

    out_p = _dynamicnet_call(
        x_p, params["w_in"], params["b_in"],
        params["w_mid"], params["b_mid"],
        params["w_out"], params["b_out"],
        n_mid=int(n_mid), tile_n=tile_n)

    return out_p if N_p == N else out_p[:N, :D_out]


def dynamicnet_reference(x, params, n_mid):
    h = jnp.maximum(x @ params["w_in"] + params["b_in"], 0.0)
    for _ in range(n_mid):
        h = jnp.maximum(h @ params["w_mid"] + params["b_mid"], 0.0)
    return h @ params["w_out"] + params["b_out"]


if __name__ == "__main__":
    # Small shapes consistent with the module's forward.
    N, D_in, H, D_out = 8, 16, 32, 8

    key = jax.random.PRNGKey(0)
    kx, k1, k2, k3, k4, k5, k6 = jax.random.split(key, 7)

    x = jax.random.normal(kx, (N, D_in), dtype=jnp.float32)

    # Deterministic parameter init (synthetic weights; shapes from __init__).
    params = {
        "w_in":  jax.random.normal(k1, (D_in, H), dtype=jnp.float32) * 0.1,
        "b_in":  jax.random.normal(k2, (1, H),    dtype=jnp.float32) * 0.1,
        "w_mid": jax.random.normal(k3, (H, H),    dtype=jnp.float32) * 0.1,
        "b_mid": jax.random.normal(k4, (1, H),    dtype=jnp.float32) * 0.1,
        "w_out": jax.random.normal(k5, (H, D_out), dtype=jnp.float32) * 0.1,
        "b_out": jax.random.normal(k6, (1, D_out), dtype=jnp.float32) * 0.1,
    }

    # Verify (and warm up) all 5 specialized variants (n_mid in 0..4).
    for k in range(5):
        out_k = jax.block_until_ready(dynamicnet_forward(x, params, k))
        ref_k = dynamicnet_reference(x, params, k)
        assert out_k.shape == (N, D_out)
        assert jnp.allclose(out_k, ref_k, atol=1e-5, rtol=1e-5), \
            f"mismatch vs reference for n_mid={k}"

    # Mimic the PyTorch module's random.randint(0, 4) deterministically.
    # TODO(synk): the per-forward random layer count is drawn on the host (as
    # in the PyTorch module) and selects one of 5 specialized kernels.
    random.seed(0)
    n_mid = random.randint(0, 4)

    out = jax.block_until_ready(dynamicnet_forward(x, params, n_mid))
    ref = dynamicnet_reference(x, params, n_mid)
    assert out.shape == (N, D_out)
    assert jnp.allclose(out, ref, atol=1e-5, rtol=1e-5), "mismatch vs reference"

    print("KERNEL_OK")
</pallas_src>

<mosaic_0001>
module attributes {stable_mosaic.version = 11 : i64} {
  func.func @kernel(%arg0: i32, %arg1: memref<8x16xf32, #tpu.memory_space<vmem>>, %arg2: memref<16x32xf32, #tpu.memory_space<vmem>>, %arg3: memref<1x32xf32, #tpu.memory_space<vmem>>, %arg4: memref<32x32xf32, #tpu.memory_space<vmem>>, %arg5: memref<1x32xf32, #tpu.memory_space<vmem>>, %arg6: memref<32x8xf32, #tpu.memory_space<vmem>>, %arg7: memref<1x8xf32, #tpu.memory_space<vmem>>, %arg8: memref<8x8xf32, #tpu.memory_space<vmem>>) attributes {dimension_semantics = [#tpu.dimension_semantics<parallel>], iteration_bounds = array<i64: 1>, scalar_prefetch = 0 : i64, scratch_operands = 0 : i64, tpu.core_type = #tpu.core_type<tc>, window_params = [{transform_indices = @transform_0, window_bounds = array<i64: 8, 16>}, {pipeline_mode = #tpu.pipeline_mode<synchronous>, transform_indices = @transform_1, window_bounds = array<i64: 16, 32>}, {pipeline_mode = #tpu.pipeline_mode<synchronous>, transform_indices = @transform_2, window_bounds = array<i64: 1, 32>}, {pipeline_mode = #tpu.pipeline_mode<synchronous>, transform_indices = @transform_3, window_bounds = array<i64: 32, 32>}, {pipeline_mode = #tpu.pipeline_mode<synchronous>, transform_indices = @transform_4, window_bounds = array<i64: 1, 32>}, {pipeline_mode = #tpu.pipeline_mode<synchronous>, transform_indices = @transform_5, window_bounds = array<i64: 32, 8>}, {pipeline_mode = #tpu.pipeline_mode<synchronous>, transform_indices = @transform_6, window_bounds = array<i64: 1, 8>}, {transform_indices = @transform_7, window_bounds = array<i64: 8, 8>}]} {
    %c0 = arith.constant 0 : index
    %c0_0 = arith.constant 0 : index
    %0 = vector.load %arg1[%c0, %c0_0] : memref<8x16xf32, #tpu.memory_space<vmem>>, vector<8x16xf32>
    %c0_1 = arith.constant 0 : index
    %c0_2 = arith.constant 0 : index
    %1 = vector.load %arg2[%c0_1, %c0_2] : memref<16x32xf32, #tpu.memory_space<vmem>>, vector<16x32xf32>
    %cst = arith.constant dense<0.000000e+00> : vector<8x32xf32>
    %2 = tpu.matmul %0, %1, %cst {dimension_numbers = #tpu.dot_dimension_numbers<[1], [0], [0], [1], [0, 0, 1, 1], [], []>} : vector<8x16xf32>, vector<16x32xf32>, vector<8x32xf32> -> vector<8x32xf32>
    %c0_3 = arith.constant 0 : index
    %c0_4 = arith.constant 0 : index
    %3 = vector.load %arg3[%c0_3, %c0_4] : memref<1x32xf32, #tpu.memory_space<vmem>>, vector<1x32xf32>
    %4 = vector.broadcast %3 : vector<1x32xf32> to vector<8x32xf32>
    %5 = arith.addf %2, %4 : vector<8x32xf32>
    %cst_5 = arith.constant 0.000000e+00 : f32
    %6 = vector.broadcast %cst_5 : f32 to vector<8x32xf32>
    %7 = arith.maximumf %5, %6 : vector<8x32xf32>
    %c0_6 = arith.constant 0 : index
    %c0_7 = arith.constant 0 : index
    %8 = vector.load %arg6[%c0_6, %c0_7] : memref<32x8xf32, #tpu.memory_space<vmem>>, vector<32x8xf32>
    %cst_8 = arith.constant dense<0.000000e+00> : vector<8x8xf32>
    %9 = tpu.matmul %7, %8, %cst_8 {dimension_numbers = #tpu.dot_dimension_numbers<[1], [0], [0], [1], [0, 0, 1, 1], [], []>} : vector<8x32xf32>, vector<32x8xf32>, vector<8x8xf32> -> vector<8x8xf32>
    %c0_9 = arith.constant 0 : index
    %c0_10 = arith.constant 0 : index
    %10 = vector.load %arg7[%c0_9, %c0_10] : memref<1x8xf32, #tpu.memory_space<vmem>>, vector<1x8xf32>
    %11 = vector.broadcast %10 : vector<1x8xf32> to vector<8x8xf32>
    %12 = arith.addf %9, %11 : vector<8x8xf32>
    %c0_11 = arith.constant 0 : index
    %c0_12 = arith.constant 0 : index
    %13 = vector.load %arg8[%c0_11, %c0_12] : memref<8x8xf32, #tpu.memory_space<vmem>>, vector<8x8xf32>
    tpu.vector_store %arg8[%c0_11, %c0_12], %12 {strides = array<i32>} : memref<8x8xf32, #tpu.memory_space<vmem>>, vector<8x8xf32>,
    return
  }
  func.func @transform_0(%arg0: i32) -> (i32, i32) {
    %c0_i32 = arith.constant 0 : i32
    %c0_i32_0 = arith.constant 0 : i32
    return %arg0, %c0_i32 : i32, i32
  }
  func.func @transform_1(%arg0: i32) -> (i32, i32) {
    %c0_i32 = arith.constant 0 : i32
    %c0_i32_0 = arith.constant 0 : i32
    %c0_i32_1 = arith.constant 0 : i32
    return %c0_i32, %c0_i32_0 : i32, i32
  }
  func.func @transform_2(%arg0: i32) -> (i32, i32) {
    %c0_i32 = arith.constant 0 : i32
    %c0_i32_0 = arith.constant 0 : i32
    %c0_i32_1 = arith.constant 0 : i32
    return %c0_i32, %c0_i32_0 : i32, i32
  }
  func.func @transform_3(%arg0: i32) -> (i32, i32) {
    %c0_i32 = arith.constant 0 : i32
    %c0_i32_0 = arith.constant 0 : i32
    %c0_i32_1 = arith.constant 0 : i32
    return %c0_i32, %c0_i32_0 : i32, i32
  }
  func.func @transform_4(%arg0: i32) -> (i32, i32) {
    %c0_i32 = arith.constant 0 : i32
    %c0_i32_0 = arith.constant 0 : i32
    %c0_i32_1 = arith.constant 0 : i32
    return %c0_i32, %c0_i32_0 : i32, i32
  }
  func.func @transform_5(%arg0: i32) -> (i32, i32) {
    %c0_i32 = arith.constant 0 : i32
    %c0_i32_0 = arith.constant 0 : i32
    %c0_i32_1 = arith.constant 0 : i32
    return %c0_i32, %c0_i32_0 : i32, i32
  }
  func.func @transform_6(%arg0: i32) -> (i32, i32) {
    %c0_i32 = arith.constant 0 : i32
    %c0_i32_0 = arith.constant 0 : i32
    %c0_i32_1 = arith.constant 0 : i32
    return %c0_i32, %c0_i32_0 : i32, i32
  }
  func.func @transform_7(%arg0: i32) -> (i32, i32) {
    %c0_i32 = arith.constant 0 : i32
    %c0_i32_0 = arith.constant 0 : i32
    return %arg0, %c0_i32 : i32, i32
  }
}

</mosaic_0001>

<bundles_post_ra>
// kernel: _dynamicnet_call.1
= control target key start
LH: loop header
LB: loop body
LE: loop exit
PB: predicated region body
PF: predicated region fallthrough
CT: control target
= control target key end

     0   :  { %12 = vsyncpa [#allocation3], 0  ;;  %s411_s0 = inlined_call_operand.hbm [shape: f32[8,16], index: 0, kind: input, shape index: {}]   ;;  %s412_s1 = inlined_call_operand.vmem [shape: f32[16,32], index: 1, kind: input, shape index: {}]   ;;  %s413_s2 = inlined_call_operand.vmem [shape: f32[1,32], index: 2, kind: input, shape index: {}]   ;;  %s414_s3 = inlined_call_operand.vmem [shape: f32[32,32], index: 3, kind: input, shape index: {}]   ;;  %s415_s4 = inlined_call_operand.vmem [shape: f32[1,32], index: 4, kind: input, shape index: {}]   ;;  %s416_s5 = inlined_call_operand.vmem [shape: f32[32,8], index: 5, kind: input, shape index: {}]   ;;  %s417_s6 = inlined_call_operand.vmem [shape: f32[1,8], index: 6, kind: input, shape index: {}]   ;;  %s418_s7 = inlined_call_operand.hbm [shape: f32[8,8], index: 7, kind: output, shape index: {}]  }
   0x1   :  { %13 = vsyncpa [#allocation4], 0  ;;  %s318_s24 = smov [#allocation2]   ;;  %s270_s3 = scalar_lea.hbm %s411_s0, 128 }
   0x2   :  { %s20_s25 = sshll.u32 %s318_s24, 4  ;;  %p271_p0 = scmp.ne.s32.totalorder %s411_s0, %s270_s3  ;;  %s21_s25 = int_to_ptr.vmem [resolvable:$true] %s20_s25 }
   0x3   :  { %p274_p1 = scmp.lt.u32.totalorder %s270_s3, %s411_s0 }
   0x5   :  { %p276_p2 = pnand %p274_p1, %p271_p0 }
   0x7   :  { %279 = shalt.err (!%p276_p2)
}
   0x8   :  { %s280_s8 = scalar_lea.vmem %s21_s25, 128  ;;  %p285_p4 = scmp.lt.s32.totalorder %s21_s25, %s21_s25 }
   0x9   :  { %p281_p3 = scmp.ne.s32.totalorder %s21_s25, %s280_s8  ;;  %p286_p5 = scmp.lt.s32.totalorder %s280_s8, %s280_s8 }
   0xb   :  { %p287_p6 = por %p286_p5, %p285_p4 }
   0xd   :  { %p288_p7 = pnand %p287_p6, %p281_p3 }
   0xf   :  { %291 = shalt.err (!%p288_p7)
}
  0x10   :  { %23 = dma.hbm_to_vmem [thread:$0]  %s411_s0, 128, %s21_s25, [#allocation3]  }
  0x11   :  { %314 = dma.done.wait [#allocation3], 128  }
  0x12   :  { %315 = vsyncadd [#allocation3], 4294967168  ;;  %v319_v0 = vmov 0.0|0.0   ;;  %vm320_vm0 = vmmov 0   ;;  %v321_v1 = vmov 0.0   ;;  %v40_v2 = vld [vmem:[%s412_s1] sm:$0xff] }
  0x13   :  { %256 = vmatprep.subr.bf16.mxu0 %v319_v0  ;;  %242 = vmatprep.mubr.msk.f32.mxu0 %vm320_vm0, %v321_v1  ;;  %v41_v3 = vld [vmem:[%s412_s1 + $0x8] sm:$0xff]  ;;  %v124_v5 = vld [vmem:[%s416_s5] sm:$0xff]  ;;  %vm49_vm1 = vcmask 130048   ;;  %v126_v9 = vld [vmem:[%s416_s5 + $0x10] sm:$0xff]  ;;  %vm135_vm2 = vcmask 261120   ;;  %s322_s25 = smov [#allocation5]  }
  0x14   :  { %259 = vmatprep.subr.bf16.mxu1 %v319_v0  ;;  %253 = vmatprep.mubr.msk.f32.mxu1 %vm320_vm0, %v321_v1  ;;  %v257_v4 = vpack.c.bf16 %v41_v3, %v40_v2  ;;  %v125_v6 = vld [vmem:[%s416_s5 + $0x8] sm:$0xff]  ;;  %v39_v8 = vld [vmem:[#allocation2] sm:$0xff]  ;;  %v127_v10 = vld [vmem:[%s416_s5 + $0x18] sm:$0xff]  ;;  %s217_s26 = sshll.u32 %s322_s25, 4  ;;  %vm209_vm3 = vcmask 64512   ;;  %s218_s26 = int_to_ptr.vmem [resolvable:$true] %s217_s26 }
  0x15   :  { %v260_v7 = vpack.c.bf16 %v125_v6, %v124_v5  ;;  %v263_v11 = vpack.c.bf16 %v127_v10, %v126_v9  ;;  %v226_v12 = vld [vmem:[%s413_s2] ss:$0 sm:$0xff]  ;;  %s292_s5 = scalar_lea.vmem %s218_s26, 128  ;;  %p297_p9 = scmp.lt.s32.totalorder %s218_s26, %s218_s26 }
  0x16   :  { %258 = vmatpush3.bf16.msra.mxu0 %v257_v4  ;;  %v228_v17 = vld [vmem:[%s417_s6] ss:$0 sm:$0xff]  ;;  %p293_p8 = scmp.ne.s32.totalorder %s218_s26, %s292_s5  ;;  %p298_p10 = scmp.lt.s32.totalorder %s292_s5, %s292_s5 }
  0x17   :  { %261 = vmatpush3.bf16.msra.mxu1 %v260_v7 }
  0x18   :  { %262 = vmatprep.subr.bf16.mxu1 %v319_v0  ;;  %p299_p11 = por %p298_p10, %p297_p9 }
  0x19   :  { %243 = vmatmul.mubr.msk.f32.vlgmr.msra.gmra.mrb[0].mxu0 %vm49_vm1, %v39_v8 }
  0x1a   :  { %p300_p12 = pnand %p299_p11, %p293_p8 }
  0x1b   :  { %264 = vmatpush3.bf16.msra.mxu1 %v263_v11 }
  0xec   :  { %v119_v13 = vpop.f32.mrb[0].mxu0 }
  0xed   :  { %v120_v14 = vadd.f32 %v226_v12, %v119_v13  ;;  %v244_v15 = vpop.f32.mrb[1].mxu0 }
  0xef   :  { %v123_v16 = vmax.f32 %v120_v14, 0.0 }
  0xf1   :  { %254 = vmatmul.mubr.msk.f32.vlgmr.msra.gmra.mrb[0].mxu1 %vm135_vm2, %v123_v16 }
 0x1c4   :  { %v205_v18 = vpop.f32.mrb[0].mxu1 }
 0x1c5   :  { %v206_v19 = vadd.f32 %v228_v17, %v205_v18  ;;  %v255_v20 = vpop.f32.mrb[1].mxu1 }
 0x1c7   :  { %210 = vst.msk [vmem:[#allocation5] sm:$0xff] %vm209_vm3, %v206_v19 }
 0x1c8   :  { %303 = shalt.err (!%p300_p12)
}
 0x1c9   :  { %s304_s3 = scalar_lea.hbm %s418_s7, 128 }
 0x1ca   :  { %p305_p13 = scmp.ne.s32.totalorder %s418_s7, %s304_s3  ;;  %p308_p0 = scmp.lt.u32.totalorder %s304_s3, %s418_s7 }
 0x1cc   :  { %p310_p1 = pnand %p308_p0, %p305_p13 }
 0x1ce   :  { %313 = shalt.err (!%p310_p1)
}
 0x1cf   :  { %220 = dma.vmem_to_hbm [thread:$0]  %s218_s26, 128, %s418_s7, [#allocation4]  }
 0x1d0   :  { %316 = dma.done.wait [#allocation4], 128  }
 0x1d1   :  { %317 = vsyncadd [#allocation4], 4294967168 }
 0x1d2   :  { %224 = vsyncpa [#allocation3], 1 }
 0x1d3   :  { %225 = vsyncpa [#allocation4], 1 }

</bundles_post_ra>
